<compile_context>
chip_gen: v5e
topology: v5e:2x2
jax: 0.10.0
libtpu: 0.0.40
codegen_flags: <defaults>
</compile_context>

<pallas_src>
import jax
import jax.numpy as jnp
from jax.experimental import pallas as pl
from jax.experimental.pallas import tpu as pltpu

NEG_MIN = float(jnp.finfo(jnp.float32).min)   # torch.finfo(float32).min


def _cross_attn_kernel(x_ref, x0_ref, bias_ref, w_ref, b_ref, o_ref):
    # x_ref:    (TB, N, D)  token stream (keys == values == raw x), input dtype
    # x0_ref:   (TB, D)     CLS rows (contiguous), input dtype
    # bias_ref: (TB, N)     additive softmax bias: 0 = keep, finfo.min = drop
    #                       (CLS column and padded keys pre-masked in wrapper)
    # w_ref:    (D, D)      fused weight  scale * Wq^T @ Wk
    # b_ref:    (1, D)      fused bias    scale * bq  @ Wk
    # o_ref:    (TB, D)     lane-dense output slab

    # --- fused query projection: the only MXU matmul left ---
    x0 = x0_ref[...].astype(jnp.float32)                           # (TB, D)
    q = jnp.dot(x0, w_ref[...], preferred_element_type=jnp.float32)
    q = q + b_ref[...]                                             # (TB, D)

    # --- scores against the raw tokens (Wk folded into q); VPU mul + lane reduce ---
    s = jnp.sum(q[:, None, :] * x_ref[...].astype(jnp.float32), axis=-1)  # (TB, N)
    s = s + bias_ref[...]

    # --- softmax over the key axis ---
    m = jnp.max(s, axis=-1, keepdims=True)
    e = jnp.exp(s - m)
    denom = jnp.sum(e, axis=-1, keepdims=True)                     # (TB, 1)
    inv = pl.reciprocal(denom, approx=True)                        # EUP slot
    inv = inv * (2.0 - denom * inv)                                # Newton step -> ~f32
    p = e * inv                                                    # (TB, N)

    # --- weighted sum of the raw value tokens; masked / CLS weights are exactly 0 ---
    out = jnp.sum(p[:, :, None] * x_ref[...].astype(jnp.float32), axis=1)  # (TB, D)
    o_ref[...] = out.astype(o_ref.dtype)


def _round_up(v, m):
    return (v + m - 1) // m * m


def _pick_block_b(B, N_pad, D, x_itemsize, budget_bytes, block_b_cap):
    """Largest TB (multiple of 8) whose double-buffered footprint fits the budget."""
    per_row = (2 * N_pad * D * x_itemsize   # x block, 2 pipeline buffers
               + 2 * D * x_itemsize         # CLS rows
               + 2 * N_pad * 4              # softmax bias
               + 2 * D * 4)                 # output block
    fixed = 2 * (D * D * 4 + D * 4)         # fused weight + bias (double buffered)
    avail = max(budget_bytes - fixed, 8 * per_row)
    tb = int(avail // per_row) // 8 * 8
    tb = max(8, min(tb, block_b_cap))

    B8 = _round_up(B, 8)
    tb = min(tb, B8)
    # Keep enough grid steps for megacore sharding / pipeline overlap when B allows.
    if B8 >= 32:
        tb = min(tb, max(8, (B8 // 4) // 8 * 8))
    elif B8 >= 16:
        tb = min(tb, 8)
    return max(8, tb)


def cross_attention(x, attn_mask, params, *, block_b=128,
                    vmem_budget_bytes=16 * 1024 * 1024):
    """x: (B, N, D), attn_mask: (B, N).  Returns (B, 1, D), like the module."""
    B, N, D = x.shape
    scale = float(D) ** (-0.5)

    # --- fold the key projection into the query (softmax shift-invariance) ---
    wq = params["wq"].astype(jnp.float32)
    wk = params["wk"].astype(jnp.float32)
    bq = params["bq"].astype(jnp.float32)
    w_fused = scale * (wq.T @ wk)                      # (D, D): q' = x0 @ w_fused + b_fused
    b_fused = (scale * (bq @ wk)).reshape(1, D)        # (1, D)
    # params["bk"] contributes only the per-row constant q.bk -> dropped (softmax-invariant).

    # --- sublane-align N; padded keys are masked out ---
    N_pad = _round_up(N, 8)
    mask_f = attn_mask.astype(jnp.float32)
    if N_pad != N:
        x = jnp.pad(x, ((0, 0), (0, N_pad - N), (0, 0)))
        mask_f = jnp.pad(mask_f, ((0, 0), (0, N_pad - N)))     # pads dropped
    mask_f = mask_f.at[:, 0].set(0.0)                          # CLS key never attended
    bias = (1.0 - mask_f) * NEG_MIN                            # (B, N_pad) f32

    x0 = x[:, 0, :]                                            # (B, D), tiny HBM copy

    # --- VMEM-budgeted batch tile ---
    TB = _pick_block_b(B, N_pad, D, x.dtype.itemsize, vmem_budget_bytes, block_b)
    B_pad = _round_up(B, TB)
    if B_pad != B:
        x = jnp.pad(x, ((0, B_pad - B), (0, 0), (0, 0)))
        x0 = jnp.pad(x0, ((0, B_pad - B), (0, 0)))
        bias = jnp.pad(bias, ((0, B_pad - B), (0, 0)))         # padded rows: benign softmax

    out = pl.pallas_call(
        _cross_attn_kernel,
        out_shape=jax.ShapeDtypeStruct((B_pad, D), x.dtype),
        grid_spec=pltpu.PrefetchScalarGridSpec(
            num_scalar_prefetch=0,
            grid=(B_pad // TB,),
            in_specs=[
                pl.BlockSpec((TB, N_pad, D), lambda i: (i, 0, 0)),  # x tokens
                pl.BlockSpec((TB, D), lambda i: (i, 0)),            # CLS rows
                pl.BlockSpec((TB, N_pad), lambda i: (i, 0)),        # softmax bias
                pl.BlockSpec((D, D), lambda i: (0, 0)),             # fused weight
                pl.BlockSpec((1, D), lambda i: (0, 0)),             # fused bias
            ],
            out_specs=pl.BlockSpec((TB, D), lambda i: (i, 0)),      # lane-dense
        ),
        compiler_params=pltpu.CompilerParams(
            dimension_semantics=("parallel",),
            vmem_limit_bytes=32 * 1024 * 1024),
    )(x, x0, bias, w_fused, b_fused)

    return out[:B].reshape(B, 1, D)


def cross_attention_ref(x, attn_mask, params):
    """Pure-JAX mirror of the PyTorch forward."""
    B, N, D = x.shape
    scale = float(D) ** (-0.5)
    k = x[:, 1:, :] @ params["wk"].T + params["bk"]
    q = x[:, 0:1, :] @ params["wq"].T + params["bq"]
    q = q * scale
    attn = q @ jnp.swapaxes(k, -2, -1)
    attn = attn + (1.0 - attn_mask[:, 1:])[:, None, :] * NEG_MIN
    attn = jax.nn.softmax(attn, axis=-1)
    return attn @ x[:, 1:, :]                          # (B, 1, D)


if __name__ == "__main__":
    def run_case(B, N, D):
        key = jax.random.PRNGKey(0)
        k1, k2, k3, k4, k5 = jax.random.split(key, 5)

        x = jax.random.normal(k1, (B, N, D), dtype=jnp.float32)
        # mask: 1 = keep, 0 = masked (last two keys of odd batch rows masked out)
        col = jnp.arange(N)[None, :]
        row = jnp.arange(B)[:, None]
        attn_mask = jnp.where((row % 2 == 1) & (col >= N - 2), 0.0, 1.0).astype(jnp.float32)

        # trunc_normal(std=0.02) ~ 0.02*normal; small nonzero biases exercise the path
        params = {
            "wq": 0.02 * jax.random.normal(k2, (D, D), dtype=jnp.float32),
            "bq": 0.02 * jax.random.normal(k3, (D,), dtype=jnp.float32),
            "wk": 0.02 * jax.random.normal(k4, (D, D), dtype=jnp.float32),
            "bk": 0.02 * jax.random.normal(k5, (D,), dtype=jnp.float32),
        }

        out = jax.block_until_ready(cross_attention(x, attn_mask, params))
        ref = cross_attention_ref(x, attn_mask, params)
        assert out.shape == (B, 1, D), out.shape
        # tolerance covers the approx-reciprocal softmax + Wk-folding rounding order
        assert jnp.allclose(out, ref, rtol=1e-4, atol=1e-4), float(
            jnp.max(jnp.abs(out - ref)))

    run_case(4, 8, 32)     # aligned shapes
    run_case(5, 11, 32)    # exercises the N- and B-padding paths

    print("KERNEL_OK")
</pallas_src>

<mosaic_0001>
module attributes {stable_mosaic.version = 11 : i64} {
  func.func @_cross_attn_kernel(%arg0: i32, %arg1: memref<8x8x32xf32, #tpu.memory_space<vmem>>, %arg2: memref<8x32xf32, #tpu.memory_space<vmem>>, %arg3: memref<8x8xf32, #tpu.memory_space<vmem>>, %arg4: memref<32x32xf32, #tpu.memory_space<vmem>>, %arg5: memref<1x32xf32, #tpu.memory_space<vmem>>, %arg6: memref<8x32xf32, #tpu.memory_space<vmem>>) attributes {dimension_semantics = [#tpu.dimension_semantics<parallel>], iteration_bounds = array<i64: 1>, scalar_prefetch = 0 : i64, scratch_operands = 0 : i64, tpu.core_type = #tpu.core_type<tc>, window_params = [{transform_indices = @transform_0, window_bounds = array<i64: 8, 8, 32>}, {transform_indices = @transform_1, window_bounds = array<i64: 8, 32>}, {transform_indices = @transform_2, window_bounds = array<i64: 8, 8>}, {pipeline_mode = #tpu.pipeline_mode<synchronous>, transform_indices = @transform_3, window_bounds = array<i64: 32, 32>}, {pipeline_mode = #tpu.pipeline_mode<synchronous>, transform_indices = @transform_4, window_bounds = array<i64: 1, 32>}, {transform_indices = @transform_5, window_bounds = array<i64: 8, 32>}]} {
    %c0 = arith.constant 0 : index
    %c0_0 = arith.constant 0 : index
    %0 = vector.load %arg2[%c0, %c0_0] : memref<8x32xf32, #tpu.memory_space<vmem>>, vector<8x32xf32>
    %c0_1 = arith.constant 0 : index
    %c0_2 = arith.constant 0 : index
    %1 = vector.load %arg4[%c0_1, %c0_2] : memref<32x32xf32, #tpu.memory_space<vmem>>, vector<32x32xf32>
    %cst = arith.constant dense<0.000000e+00> : vector<8x32xf32>
    %2 = tpu.matmul %0, %1, %cst {dimension_numbers = #tpu.dot_dimension_numbers<[1], [0], [0], [1], [0, 0, 1, 1], [], []>} : vector<8x32xf32>, vector<32x32xf32>, vector<8x32xf32> -> vector<8x32xf32>
    %c0_3 = arith.constant 0 : index
    %c0_4 = arith.constant 0 : index
    %3 = vector.load %arg5[%c0_3, %c0_4] : memref<1x32xf32, #tpu.memory_space<vmem>>, vector<1x32xf32>
    %4 = vector.broadcast %3 : vector<1x32xf32> to vector<8x32xf32>
    %5 = arith.addf %2, %4 : vector<8x32xf32>
    %6 = vector.shape_cast %5 : vector<8x32xf32> to vector<8x1x32xf32>
    %c0_5 = arith.constant 0 : index
    %c0_6 = arith.constant 0 : index
    %c0_7 = arith.constant 0 : index
    %7 = vector.load %arg1[%c0_5, %c0_6, %c0_7] : memref<8x8x32xf32, #tpu.memory_space<vmem>>, vector<8x8x32xf32>
    %8 = vector.broadcast %6 : vector<8x1x32xf32> to vector<8x8x32xf32>
    %9 = arith.mulf %8, %7 : vector<8x8x32xf32>
    %cst_8 = arith.constant dense<0.000000e+00> : vector<8x8xf32>
    %10 = vector.multi_reduction <add>, %9, %cst_8 [2] : vector<8x8x32xf32> to vector<8x8xf32>
    %c0_9 = arith.constant 0 : index
    %c0_10 = arith.constant 0 : index
    %11 = vector.load %arg3[%c0_9, %c0_10] : memref<8x8xf32, #tpu.memory_space<vmem>>, vector<8x8xf32>
    %12 = arith.addf %10, %11 : vector<8x8xf32>
    %cst_11 = arith.constant dense<0xFF800000> : vector<8xf32>
    %13 = vector.multi_reduction <maximumf>, %12, %cst_11 [1] : vector<8x8xf32> to vector<8xf32>
    %14 = vector.shape_cast %13 : vector<8xf32> to vector<8x1xf32>
    %15 = vector.broadcast %14 : vector<8x1xf32> to vector<8x8xf32>
    %16 = arith.subf %12, %15 : vector<8x8xf32>
    %17 = math.exp %16 : vector<8x8xf32>
    %cst_12 = arith.constant dense<0.000000e+00> : vector<8xf32>
    %18 = vector.multi_reduction <add>, %17, %cst_12 [1] : vector<8x8xf32> to vector<8xf32>
    %19 = vector.shape_cast %18 : vector<8xf32> to vector<8x1xf32>
    %20 = tpu.reciprocal %19 {approx = true} : vector<8x1xf32> -> vector<8x1xf32>
    %21 = arith.mulf %19, %20 : vector<8x1xf32>
    %cst_13 = arith.constant 2.000000e+00 : f32
    %22 = vector.broadcast %cst_13 : f32 to vector<8x1xf32>
    %23 = arith.subf %22, %21 : vector<8x1xf32>
    %24 = arith.mulf %20, %23 : vector<8x1xf32>
    %25 = vector.broadcast %24 : vector<8x1xf32> to vector<8x8xf32>
    %26 = arith.mulf %17, %25 : vector<8x8xf32>
    %27 = vector.shape_cast %26 : vector<8x8xf32> to vector<8x8x1xf32>
    %c0_14 = arith.constant 0 : index
    %c0_15 = arith.constant 0 : index
    %c0_16 = arith.constant 0 : index
    %28 = vector.load %arg1[%c0_14, %c0_15, %c0_16] : memref<8x8x32xf32, #tpu.memory_space<vmem>>, vector<8x8x32xf32>
    %29 = vector.broadcast %27 : vector<8x8x1xf32> to vector<8x8x32xf32>
    %30 = arith.mulf %29, %28 : vector<8x8x32xf32>
    %cst_17 = arith.constant dense<0.000000e+00> : vector<8x32xf32>
    %31 = vector.multi_reduction <add>, %30, %cst_17 [1] : vector<8x8x32xf32> to vector<8x32xf32>
    %c0_18 = arith.constant 0 : index
    %c0_19 = arith.constant 0 : index
    %32 = vector.load %arg6[%c0_18, %c0_19] : memref<8x32xf32, #tpu.memory_space<vmem>>, vector<8x32xf32>
    tpu.vector_store %arg6[%c0_18, %c0_19], %31 {strides = array<i32>} : memref<8x32xf32, #tpu.memory_space<vmem>>, vector<8x32xf32>,
    return
  }
  func.func @transform_0(%arg0: i32) -> (i32, i32, i32) {
    %c0_i32 = arith.constant 0 : i32
    %c0_i32_0 = arith.constant 0 : i32
    %c0_i32_1 = arith.constant 0 : i32
    return %arg0, %c0_i32, %c0_i32_0 : i32, i32, i32
  }
  func.func @transform_1(%arg0: i32) -> (i32, i32) {
    %c0_i32 = arith.constant 0 : i32
    %c0_i32_0 = arith.constant 0 : i32
    return %arg0, %c0_i32 : i32, i32
  }
  func.func @transform_2(%arg0: i32) -> (i32, i32) {
    %c0_i32 = arith.constant 0 : i32
    %c0_i32_0 = arith.constant 0 : i32
    return %arg0, %c0_i32 : i32, i32
  }
  func.func @transform_3(%arg0: i32) -> (i32, i32) {
    %c0_i32 = arith.constant 0 : i32
    %c0_i32_0 = arith.constant 0 : i32
    %c0_i32_1 = arith.constant 0 : i32
    return %c0_i32, %c0_i32_0 : i32, i32
  }
  func.func @transform_4(%arg0: i32) -> (i32, i32) {
    %c0_i32 = arith.constant 0 : i32
    %c0_i32_0 = arith.constant 0 : i32
    %c0_i32_1 = arith.constant 0 : i32
    return %c0_i32, %c0_i32_0 : i32, i32
  }
  func.func @transform_5(%arg0: i32) -> (i32, i32) {
    %c0_i32 = arith.constant 0 : i32
    %c0_i32_0 = arith.constant 0 : i32
    return %arg0, %c0_i32 : i32, i32
  }
}

</mosaic_0001>

<bundles_post_ra>
// kernel: tpu_custom_call.1
= control target key start
LH: loop header
LB: loop body
LE: loop exit
PB: predicated region body
PF: predicated region fallthrough
CT: control target
= control target key end

     0   :  { %10 = vsyncpa [#allocation3], 0  ;;  %s912_s0 = inlined_call_operand.hbm [shape: f32[8,8,32], index: 0, kind: input, shape index: {}]   ;;  %s913_s1 = inlined_call_operand.hbm [shape: f32[8,32], index: 1, kind: input, shape index: {}]   ;;  %s914_s2 = inlined_call_operand.hbm [shape: f32[8,8], index: 2, kind: input, shape index: {}]   ;;  %s915_s3 = inlined_call_operand.hbm [shape: f32[32,32], index: 3, kind: input, shape index: {}]   ;;  %s916_s4 = inlined_call_operand.vmem [shape: f32[1,32], index: 4, kind: input, shape index: {}]   ;;  %s917_s5 = inlined_call_operand.hbm [shape: f32[8,32], index: 5, kind: output, shape index: {}]  }
   0x1   :  { %11 = vsyncpa [#allocation6], 0 }
   0x2   :  { %12 = vsyncpa [#allocation9], 0  ;;  %s32_s20 = sshll.u32 %s913_s1, 4  ;;  %s33_s20 = int_to_ptr.hbm [resolvable:$true] %s32_s20 }
   0x3   :  { %13 = vsyncpa [#allocation4], 0  ;;  %s735_s21 = smov [#allocation5]   ;;  %s18_s25 = sshll.u32 %s912_s0, 4  ;;  %s19_s25 = int_to_ptr.hbm [resolvable:$true] %s18_s25 }
   0x4   :  { %s34_s22 = sshll.u32 %s735_s21, 4  ;;  %s736_s26 = smov [#allocation2]   ;;  %s35_s22 = int_to_ptr.vmem [resolvable:$true] %s34_s22 }
   0x5   :  { %37 = dma.hbm_to_vmem [thread:$0]  %s33_s20, 128, %s35_s22, [#allocation6]  }
   0x6   :  { %s20_s27 = sshll.u32 %s736_s26, 4  ;;  %s737_s28 = smov 128   ;;  %s21_s27 = int_to_ptr.vmem [resolvable:$true] %s20_s27 }
   0x7   :  { %s738_s29 = smov 8   ;;  %s43_s1 = sshll.u32 %s914_s2, 4  ;;  %s44_s1 = int_to_ptr.hbm [resolvable:$true] %s43_s1 }
   0x8   :  { %26 = dma.hbm_to_vmem [thread:$0]  %s19_s25, 1024, %s21_s27, [#allocation3], %s737_s28, %s737_s28, %s738_s29  }
   0x9   :  { %s739_s7 = smov [#allocation7]   ;;  %s53_s0 = sshll.u32 %s915_s3, 4  ;;  %s54_s0 = int_to_ptr.hbm [resolvable:$true] %s53_s0 }
   0xa   :  { %s45_s8 = sshll.u32 %s739_s7, 4  ;;  %s740_s11 = smov [#allocation8]   ;;  %s46_s8 = int_to_ptr.vmem [resolvable:$true] %s45_s8 }
   0xb   :  { %48 = dma.hbm_to_vmem [thread:$0]  %s44_s1, 128, %s46_s8, [#allocation6]  }
   0xc   :  { %s55_s12 = sshll.u32 %s740_s11, 4  ;;  %s56_s12 = int_to_ptr.vmem [resolvable:$true] %s55_s12 }
   0xd   :  { %61 = dma.hbm_to_vmem [thread:$0]  %s54_s0, 512, %s56_s12, [#allocation9], %s737_s28, %s737_s28, %s738_s29  }
   0xe   :  { %727 = dma.done.wait [#allocation3], 1024  }
   0xf   :  { %728 = vsyncadd [#allocation3], 4294966272 }
  0x10   :  { %729 = dma.done.wait [#allocation6], 256  }
  0x11   :  { %730 = vsyncadd [#allocation6], 4294967040 }
  0x12   :  { %731 = dma.done.wait [#allocation9], 512  }
  0x13   :  { %732 = vsyncadd [#allocation9], 4294966784  ;;  %v180_v0 = vlaneseq  ;;  %v84_v2 = vld [vmem:[#allocation8 + $0x18] sm:$0xff]  ;;  %v83_v3 = vld [vmem:[#allocation8 + $0x10] sm:$0xff]  ;;  %vm89_vm0 = vcmask 261120   ;;  %v741_v59 = vmov 0  }
  0x14   :  { %105 = vmatpush.msra.mxu0 %v84_v2  ;;  %v177_v4 = vld [vmem:[#allocation7] sm:$0xff]  ;;  %v82_v5 = vld [vmem:[#allocation8 + $0x8] sm:$0xff]  ;;  %v81_v8 = vld [vmem:[#allocation8] sm:$0xff]  ;;  %vm293_vm1 = vcmask 1041409   ;;  %vm295_vm2 = vcmask 1042434   ;;  %vm297_vm3 = vcmask 1043459  }
  0x15   :  { %v181_v1 = vshrl.u32 %v180_v0, 7  ;;  %v186_v6 = vperm.slane %v177_v4, 1  ;;  %v179_v7 = vperm.slane %v177_v4, 0  ;;  %v80_v9 = vld [vmem:[#allocation5] sm:$0xff]  ;;  %v193_v10 = vperm.slane %v177_v4, 2  ;;  %v792_v24 = vld [vmem:[#allocation2 + $0x18] sm:$0xff] }
  0x16   :  { %106 = vmatpush.msra.mxu0 %v83_v3  ;;  %v200_v11 = vperm.slane %v177_v4, 3  ;;  %v228_v12 = vperm.slane %v177_v4, 7  ;;  %v207_v13 = vperm.slane %v177_v4, 4  ;;  %v214_v14 = vperm.slane %v177_v4, 5  ;;  %v588_v16 = vld [vmem:[%s916_s4] ss:$0 sm:$0xff] }
  0x17   :  { %583 = vset.pattern.permute.xlu2 %v181_v1  ;;  %582 = vset.pattern.permute.xlu1 %v181_v1  ;;  %v221_v15 = vperm.slane %v177_v4, 6  ;;  %v790_v19 = vld [vmem:[#allocation2] sm:$0xff]  ;;  %v794_v25 = vld [vmem:[#allocation2 + $0x10] sm:$0xff]  ;;  %v800_v34 = vld [vmem:[#allocation2 + $0x8] sm:$0xff]  ;;  %vm299_vm4 = vcmask 1044484   ;;  %vm301_vm5 = vcmask 1045509  }
  0x18   :  { %584 = vset.pattern.permute.xlu0 %v181_v1  ;;  %107 = vmatpush.msra.mxu0 %v82_v5  ;;  %v804_v38 = vld [vmem:[#allocation2 + $0x20] sm:$0xff]  ;;  %v809_v45 = vld [vmem:[#allocation2 + $0x28] sm:$0xff]  ;;  %v812_v48 = vld [vmem:[#allocation2 + $0x30] sm:$0xff]  ;;  %vm303_vm6 = vcmask 1046534   ;;  %vm305_vm7 = vcmask 1047559   ;;  %vm308_vm8 = vcmask 64512  }
  0x19   :  { %v818_v55 = vld [vmem:[#allocation2 + $0x38] sm:$0xff]  ;;  %s742_s4 = smov [#allocation10]   ;;  %s561_s16 = sshll.u32 %s917_s5, 4  ;;  %s562_s16 = int_to_ptr.hbm [resolvable:$true] %s561_s16 }
  0x1a   :  { %108 = vmatpush.msra.mxu0 %v81_v8  ;;  %s559_s13 = sshll.u32 %s742_s4, 4  ;;  %s560_s13 = int_to_ptr.vmem [resolvable:$true] %s559_s13 }
  0x1b   :  { %573 = vmatmul.msk.f32.vlgmr.msra.gmra.mxu0 %vm89_vm0, %v80_v9 }
  0x1f   :  { %191 = vperm.xlu2 %583, %v186_v6   ;;  %184 = vperm.xlu1 %582, %v179_v7  }
  0x20   :  { %198 = vperm.xlu0 %584, %v193_v10  }
  0x27   :  { %205 = vperm.xlu2 %583, %v200_v11   ;;  %233 = vperm.xlu1 %582, %v228_v12  }
  0x28   :  { %586 = vset.pattern.permute.xlu0 %v741_v59 }
  0x2f   :  { %212 = vperm.xlu2 %583, %v207_v13   ;;  %587 = vset.pattern.permute.xlu1 %v741_v59 }
  0x37   :  { %219 = vperm.xlu2 %583, %v214_v14  }
  0x3f   :  { %226 = vperm.xlu2 %583, %v221_v15  }
  0x47   :  { %585 = vset.pattern.permute.xlu2 %v741_v59 }
  0x79   :  { %v192_v58 = vpop.permute.xlu2 %191 }
  0x81   :  { %v206_v60 = vpop.permute.xlu2 %205 }
  0x89   :  { %v213_v62 = vpop.permute.xlu2 %212 }
  0x91   :  { %v185_v61 = vpop.permute.xlu1 %184  ;;  %v220_v2 = vpop.permute.xlu2 %219 }
  0x92   :  { %v199_v63 = vpop.permute.xlu0 %198 }
  0x98   :  { %v110_v17 = vpop.f32.mrf.mxu0 }
  0x99   :  { %v111_v18 = vadd.f32 %v588_v16, %v110_v17  ;;  %v234_v1 = vpop.permute.xlu1 %233  ;;  %v227_v6 = vpop.permute.xlu2 %226 }
  0x9b   :  { %v129_v20 = vperm.slane %v111_v18, 0  ;;  %v116_v21 = vrot.slane %v111_v18, 3  ;;  %v115_v22 = vrot.slane %v111_v18, 2  ;;  %v114_v23 = vrot.slane %v111_v18, 1 }
  0x9c   :  { %v117_v29 = vrot.slane %v111_v18, 4  ;;  %v118_v40 = vrot.slane %v111_v18, 5  ;;  %v119_v42 = vrot.slane %v111_v18, 6  ;;  %v120_v51 = vrot.slane %v111_v18, 7 }
  0x9d   :  { %v145_v26 = vmul.f32 %v129_v20, %v790_v19  ;;  %v132_v27 = vperm.slane %v116_v21, 0  ;;  %v131_v28 = vperm.slane %v115_v22, 0  ;;  %v130_v33 = vperm.slane %v114_v23, 0 }
  0x9e   :  { %v133_v37 = vperm.slane %v117_v29, 0  ;;  %v134_v44 = vperm.slane %v118_v40, 0  ;;  %v135_v47 = vperm.slane %v119_v42, 0  ;;  %v136_v54 = vperm.slane %v120_v51, 0 }
  0x9f   :  { %v153_v30 = vsel %vm89_vm0, %v145_v26, 0.0  ;;  %v148_v31 = vmul.f32 %v132_v27, %v792_v24  ;;  %v147_v32 = vmul.f32 %v131_v28, %v794_v25  ;;  %v146_v39 = vmul.f32 %v130_v33, %v800_v34 }
  0xa0   :  { %154 = vadd.xlane.f32.xlu0 %v153_v30  ;;  %v149_v41 = vmul.f32 %v133_v37, %v804_v38  ;;  %v150_v49 = vmul.f32 %v134_v44, %v809_v45  ;;  %v151_v50 = vmul.f32 %v135_v47, %v812_v48  ;;  %v152_v56 = vmul.f32 %v136_v54, %v818_v55 }
  0xa1   :  { %v162_v35 = vsel %vm89_vm0, %v148_v31, 0.0  ;;  %v159_v36 = vsel %vm89_vm0, %v147_v32, 0.0  ;;  %v156_v43 = vsel %vm89_vm0, %v146_v39, 0.0  ;;  %v835_v26 = vand.u32 127, %v180_v0 }
  0xa2   :  { %163 = vadd.xlane.f32.xlu2 %v162_v35  ;;  %160 = vadd.xlane.f32.xlu1 %v159_v36  ;;  %v165_v46 = vsel %vm89_vm0, %v149_v41, 0.0  ;;  %v168_v52 = vsel %vm89_vm0, %v150_v49, 0.0  ;;  %v171_v53 = vsel %vm89_vm0, %v151_v50, 0.0  ;;  %v174_v57 = vsel %vm89_vm0, %v152_v56, 0.0 }
  0xa8   :  { %157 = vadd.xlane.f32.xlu0 %v156_v43 }
  0xaa   :  { %166 = vadd.xlane.f32.xlu1 %v165_v46 }
  0xb0   :  { %169 = vadd.xlane.f32.xlu0 %v168_v52 }
  0xb2   :  { %172 = vadd.xlane.f32.xlu1 %v171_v53 }
  0xba   :  { %175 = vadd.xlane.f32.xlu1 %v174_v57 }
 0x113   :  { %v155_v3 = vpop.xlane.xlu0 %154 }
 0x114   :  { %v243_v4 = vadd.f32 %v185_v61, %v155_v3 }
 0x115   :  { %v161_v5 = vpop.xlane.xlu1 %160  ;;  %v164_v12 = vpop.xlane.xlu2 %163 }
 0x116   :  { %260 = vperm.xlu2 %585, %v243_v4   ;;  %v822_v8 = vadd.f32 %v199_v63, %v161_v5  ;;  %v246_v13 = vadd.f32 %v206_v60, %v164_v12 }
 0x11b   :  { %v158_v7 = vpop.xlane.xlu0 %157 }
 0x11c   :  { %v244_v9 = vadd.f32 %v192_v58, %v158_v7 }
 0x11d   :  { %v167_v10 = vpop.xlane.xlu1 %166 }
 0x11e   :  { %v824_v11 = vadd.f32 %v213_v62, %v167_v10  ;;  %266 = vperm.xlu2 %585, %v822_v8   ;;  %263 = vperm.xlu0 %586, %v244_v9  }
 0x120   :  { %272 = vperm.xlu1 %587, %v824_v11  }
 0x123   :  { %v170_v16 = vpop.xlane.xlu0 %169 }
 0x124   :  { %v248_v17 = vadd.f32 %v220_v2, %v170_v16 }
 0x125   :  { %v173_v14 = vpop.xlane.xlu1 %172 }
 0x126   :  { %v828_v15 = vadd.f32 %v227_v6, %v173_v14  ;;  %269 = vperm.xlu2 %585, %v246_v13  }
 0x128   :  { %278 = vperm.xlu1 %587, %v828_v15  }
 0x12d   :  { %v176_v18 = vpop.xlane.xlu1 %175 }
 0x12e   :  { %275 = vperm.xlu2 %585, %v248_v17   ;;  %v831_v20 = vadd.f32 %v234_v1, %v176_v18 }
 0x136   :  { %281 = vperm.xlu2 %585, %v831_v20  }
 0x170   :  { %v261_v21 = vpop.permute.xlu2 %260 }
 0x171   :  { %v285_v29 = vperm.slane %v261_v21, %v835_v26 }
 0x178   :  { %v267_v22 = vpop.permute.xlu2 %266 }
 0x179   :  { %v287_v31 = vperm.slane %v267_v22, %v835_v26 }
 0x180   :  { %v270_v23 = vpop.permute.xlu2 %269 }
 0x181   :  { %v288_v35 = vperm.slane %v270_v23, %v835_v26 }
 0x188   :  { %v276_v27 = vpop.permute.xlu2 %275 }
 0x189   :  { %v290_v41 = vperm.slane %v276_v27, %v835_v26 }
 0x190   :  { %v264_v28 = vpop.permute.xlu0 %263  ;;  %v282_v39 = vpop.permute.xlu2 %281 }
 0x191   :  { %v286_v30 = vperm.slane %v264_v28, %v835_v26  ;;  %v292_v44 = vperm.slane %v282_v39, %v835_v26 }
 0x192   :  { %v273_v32 = vpop.permute.xlu1 %272 }
 0x193   :  { %v294_v33 = vsel %vm293_vm1, %v286_v30, %v285_v29  ;;  %v289_v0 = vperm.slane %v273_v32, %v835_v26 }
 0x194   :  { %v296_v36 = vsel %vm295_vm2, %v287_v31, %v294_v33 }
 0x195   :  { %v298_v37 = vsel %vm297_vm3, %v288_v35, %v296_v36 }
 0x196   :  { %v300_v40 = vsel %vm299_vm4, %v289_v0, %v298_v37 }
 0x197   :  { %v302_v46 = vsel %vm301_vm5, %v290_v41, %v300_v40 }
 0x19a   :  { %v279_v42 = vpop.permute.xlu1 %278 }
 0x19b   :  { %v291_v43 = vperm.slane %v279_v42, %v835_v26 }
 0x19d   :  { %v304_v47 = vsel %vm303_vm6, %v291_v43, %v302_v46 }
 0x19e   :  { %v306_v49 = vsel %vm305_vm7, %v292_v44, %v304_v47 }
 0x19f   :  { %v309_v50 = vsel %vm308_vm8, %v306_v49, -inf }
 0x1a0   :  { %310 = vmax.xlane.f32.xlu1 %v309_v50 }
 0x213   :  { %v311_v51 = vpop.xlane.xlu1 %310 }
 0x214   :  { %v314_v52 = vperm.slane %v311_v51, 1  ;;  %v313_v53 = vperm.slane %v311_v51, 0  ;;  %v316_v57 = vperm.slane %v311_v51, 3  ;;  %v315_v58 = vperm.slane %v311_v51, 2 }
 0x215   :  { %v318_v1 = vperm.slane %v311_v51, 5  ;;  %v317_v3 = vperm.slane %v311_v51, 4  ;;  %v320_v10 = vperm.slane %v311_v51, 7  ;;  %v319_v12 = vperm.slane %v311_v51, 6 }
 0x216   :  { %v330_v54 = vsub.f32 %v244_v9, %v314_v52  ;;  %v329_v56 = vsub.f32 %v243_v4, %v313_v53  ;;  %v332_v61 = vsub.f32 %v246_v13, %v316_v57  ;;  %v331_v62 = vsub.f32 %v822_v8, %v315_v58 }
 0x217   :  { %v334_v4 = vsub.f32 %v248_v17, %v318_v1  ;;  %v333_v7 = vsub.f32 %v824_v11, %v317_v3  ;;  %v336_v16 = vsub.f32 %v831_v20, %v320_v10  ;;  %v335_v18 = vsub.f32 %v828_v15, %v319_v12 }
 0x218   :  { %v339_v59 = vmul.f32 1.442695, %v330_v54  ;;  %v337_v60 = vmul.f32 1.442695, %v329_v56  ;;  %v343_v63 = vmul.f32 1.442695, %v332_v61 }
 0x219   :  { %v341_v2 = vmul.f32 1.442695, %v331_v62  ;;  %v347_v9 = vmul.f32 1.442695, %v334_v4  ;;  %v345_v8 = vmul.f32 1.442695, %v333_v7 }
 0x21a   :  { %589 = vpow2.f32 %v339_v59  ;;  %v351_v17 = vmul.f32 1.442695, %v336_v16  ;;  %v349_v21 = vmul.f32 1.442695, %v335_v18 }
 0x21b   :  { %591 = vpow2.f32 %v337_v60 }
 0x21c   :  { %593 = vpow2.f32 %v343_v63 }
 0x21d   :  { %595 = vpow2.f32 %v341_v2 }
 0x21e   :  { %597 = vpow2.f32 %v347_v9 }
 0x21f   :  { %599 = vpow2.f32 %v345_v8 }
 0x220   :  { %v854_v5 = vpop.eup %589  ;;  %601 = vpow2.f32 %v351_v17 }
 0x221   :  { %v856_v6 = vpop.eup %591  ;;  %365 = vperm.xlu0 %586, %v854_v5   ;;  %603 = vpow2.f32 %v349_v21 }
 0x222   :  { %362 = vperm.xlu2 %585, %v856_v6   ;;  %v861_v13 = vpop.eup %593 }
 0x223   :  { %v596_v14 = vpop.eup %595 }
 0x224   :  { %v598_v22 = vpop.eup %597 }
 0x225   :  { %v600_v11 = vpop.eup %599 }
 0x226   :  { %v602_v23 = vpop.eup %601 }
 0x227   :  { %v604_v27 = vpop.eup %603 }
 0x229   :  { %371 = vperm.xlu0 %586, %v861_v13  }
 0x22a   :  { %368 = vperm.xlu2 %585, %v596_v14  }
 0x231   :  { %377 = vperm.xlu0 %586, %v598_v22  }
 0x232   :  { %374 = vperm.xlu2 %585, %v600_v11  }
 0x239   :  { %383 = vperm.xlu0 %586, %v602_v23  }
 0x23a   :  { %380 = vperm.xlu2 %585, %v604_v27  }
 0x27c   :  { %v363_v28 = vpop.permute.xlu2 %362 }
 0x27d   :  { %v385_v15 = vperm.slane %v363_v28, %v835_v26 }
 0x284   :  { %v369_v30 = vpop.permute.xlu2 %368 }
 0x285   :  { %v387_v36 = vperm.slane %v369_v30, %v835_v26 }
 0x28c   :  { %v375_v20 = vpop.permute.xlu2 %374 }
 0x28d   :  { %v389_v41 = vperm.slane %v375_v20, %v835_v26 }
 0x293   :  { %v366_v29 = vpop.permute.xlu0 %365 }
 0x294   :  { %v386_v32 = vperm.slane %v366_v29, %v835_v26  ;;  %v381_v42 = vpop.permute.xlu2 %380 }
 0x295   :  { %v391_v46 = vperm.slane %v381_v42, %v835_v26 }
 0x296   :  { %v393_v33 = vsel %vm293_vm1, %v386_v32, %v385_v15 }
 0x297   :  { %v394_v37 = vsel %vm295_vm2, %v387_v36, %v393_v33 }
 0x29b   :  { %v372_v31 = vpop.permute.xlu0 %371 }
 0x29c   :  { %v388_v35 = vperm.slane %v372_v31, %v835_v26 }
 0x29e   :  { %v395_v39 = vsel %vm297_vm3, %v388_v35, %v394_v37 }
 0x29f   :  { %v396_v43 = vsel %vm299_vm4, %v389_v41, %v395_v39 }
 0x2a3   :  { %v378_v0 = vpop.permute.xlu0 %377 }
 0x2a4   :  { %v390_v40 = vperm.slane %v378_v0, %v835_v26 }
 0x2a6   :  { %v397_v44 = vsel %vm301_vm5, %v390_v40, %v396_v43 }
 0x2a7   :  { %v398_v50 = vsel %vm303_vm6, %v391_v46, %v397_v44 }
 0x2ab   :  { %v384_v47 = vpop.permute.xlu0 %383 }
 0x2ac   :  { %v392_v49 = vperm.slane %v384_v47, %v835_v26 }
 0x2ae   :  { %v399_v51 = vsel %vm305_vm7, %v392_v49, %v398_v50 }
 0x2af   :  { %v401_v52 = vsel %vm308_vm8, %v399_v51, 0.0 }
 0x2b0   :  { %402 = vadd.xlane.f32.xlu2 %v401_v52 }
 0x323   :  { %v403_v53 = vpop.xlane.xlu2 %402 }
 0x324   :  { %605 = vrcp.f32 %v403_v53 }
 0x32a   :  { %v606_v54 = vpop.eup %605 }
 0x32b   :  { %v405_v56 = vmul.f32 %v606_v54, %v403_v53 }
 0x32d   :  { %v406_v57 = vsub.f32 2.0, %v405_v56 }
 0x32f   :  { %v407_v58 = vmul.f32 %v606_v54, %v406_v57 }
 0x331   :  { %v410_v59 = vperm.slane %v407_v58, 1  ;;  %v409_v60 = vperm.slane %v407_v58, 0  ;;  %v414_v26 = vperm.slane %v407_v58, 5  ;;  %v411_v63 = vperm.slane %v407_v58, 2 }
 0x332   :  { %v416_v3 = vperm.slane %v407_v58, 7  ;;  %v412_v4 = vperm.slane %v407_v58, 3  ;;  %v413_v10 = vperm.slane %v407_v58, 4 }
 0x333   :  { %v426_v61 = vmul.f32 %v854_v5, %v410_v59  ;;  %v425_v62 = vmul.f32 %v856_v6, %v409_v60  ;;  %v430_v1 = vmul.f32 %v598_v22, %v414_v26  ;;  %v427_v2 = vmul.f32 %v596_v14, %v411_v63 }
 0x334   :  { %v432_v7 = vmul.f32 %v602_v23, %v416_v3  ;;  %v428_v9 = vmul.f32 %v861_v13, %v412_v4  ;;  %v429_v8 = vmul.f32 %v600_v11, %v413_v10  ;;  %v415_v5 = vperm.slane %v407_v58, 6 }
 0x335   :  { %440 = vperm.xlu1 %587, %v426_v61   ;;  %435 = vperm.xlu0 %586, %v425_v62  }
 0x336   :  { %v431_v6 = vmul.f32 %v604_v27, %v415_v5 }
 0x33d   :  { %460 = vperm.xlu1 %587, %v430_v1   ;;  %445 = vperm.xlu0 %586, %v427_v2  }
 0x345   :  { %470 = vperm.xlu1 %587, %v432_v7   ;;  %450 = vperm.xlu0 %586, %v428_v9  }
 0x34d   :  { %455 = vperm.xlu0 %586, %v429_v8  }
 0x355   :  { %465 = vperm.xlu0 %586, %v431_v6  }
 0x3a7   :  { %v441_v12 = vpop.permute.xlu1 %440  ;;  %v436_v16 = vpop.permute.xlu0 %435 }
 0x3a8   :  { %v474_v14 = vmul.f32 %v441_v12, %v800_v34  ;;  %v473_v21 = vmul.f32 %v436_v16, %v790_v19 }
 0x3aa   :  { %v488_v13 = vsel %vm89_vm0, %v474_v14, 0.0  ;;  %v481_v23 = vsel %vm89_vm0, %v473_v21, 0.0 }
 0x3ab   :  { %v489_v29 = vrot.slane %v488_v13, 4  ;;  %v482_v27 = vrot.slane %v481_v23, 4 }
 0x3ad   :  { %v490_v15 = vadd.f32 %v489_v29, %v488_v13  ;;  %v483_v33 = vadd.f32 %v482_v27, %v481_v23 }
 0x3af   :  { %v461_v18 = vpop.permute.xlu1 %460  ;;  %v446_v17 = vpop.permute.xlu0 %445  ;;  %v491_v40 = vrot.slane %v490_v15, 2  ;;  %v484_v41 = vrot.slane %v483_v33, 2 }
 0x3b0   :  { %v475_v22 = vmul.f32 %v446_v17, %v794_v25  ;;  %v478_v20 = vmul.f32 %v461_v18, %v809_v45 }
 0x3b1   :  { %v492_v47 = vadd.f32 %v491_v40, %v490_v15  ;;  %v485_v49 = vadd.f32 %v484_v41, %v483_v33 }
 0x3b2   :  { %v495_v11 = vsel %vm89_vm0, %v475_v22, 0.0  ;;  %v516_v35 = vsel %vm89_vm0, %v478_v20, 0.0 }
 0x3b3   :  { %v496_v32 = vrot.slane %v495_v11, 4  ;;  %v493_v58 = vrot.slane %v492_v47, 1  ;;  %v486_v59 = vrot.slane %v485_v49, 1 }
 0x3b5   :  { %v497_v36 = vadd.f32 %v496_v32, %v495_v11  ;;  %v494_v4 = vadd.f32 %v493_v58, %v492_v47  ;;  %v487_v7 = vadd.f32 %v486_v59, %v485_v49 }
 0x3b7   :  { %v451_v28 = vpop.permute.xlu0 %450  ;;  %v471_v30 = vpop.permute.xlu1 %470  ;;  %v498_v42 = vrot.slane %v497_v36, 2  ;;  %v545_v18 = vsel %vm293_vm1, %v494_v4, %v487_v7 }
 0x3b8   :  { %v476_v31 = vmul.f32 %v451_v28, %v792_v24  ;;  %v480_v19 = vmul.f32 %v471_v30, %v818_v55  ;;  %v517_v24 = vrot.slane %v516_v35, 4 }
 0x3b9   :  { %v499_v51 = vadd.f32 %v498_v42, %v497_v36 }
 0x3ba   :  { %v502_v34 = vsel %vm89_vm0, %v476_v31, 0.0  ;;  %v530_v37 = vsel %vm89_vm0, %v480_v19, 0.0  ;;  %v518_v50 = vadd.f32 %v517_v24, %v516_v35 }
 0x3bb   :  { %v503_v25 = vrot.slane %v502_v34, 4  ;;  %v531_v43 = vrot.slane %v530_v37, 4  ;;  %v500_v61 = vrot.slane %v499_v51, 1 }
 0x3bc   :  { %v519_v60 = vrot.slane %v518_v50, 2 }
 0x3bd   :  { %v504_v0 = vadd.f32 %v503_v25, %v502_v34  ;;  %v532_v53 = vadd.f32 %v531_v43, %v530_v37  ;;  %v501_v10 = vadd.f32 %v500_v61, %v499_v51 }
 0x3be   :  { %v520_v9 = vadd.f32 %v519_v60, %v518_v50 }
 0x3bf   :  { %v456_v39 = vpop.permute.xlu0 %455  ;;  %v505_v44 = vrot.slane %v504_v0, 2  ;;  %v533_v26 = vrot.slane %v532_v53, 2  ;;  %v546_v17 = vsel %vm295_vm2, %v501_v10, %v545_v18 }
 0x3c0   :  { %v477_v45 = vmul.f32 %v456_v39, %v804_v38 }
 0x3c1   :  { %v506_v54 = vadd.f32 %v505_v44, %v504_v0  ;;  %v534_v5 = vadd.f32 %v533_v26, %v532_v53 }
 0x3c2   :  { %v509_v55 = vsel %vm89_vm0, %v477_v45, 0.0 }
 0x3c3   :  { %v510_v46 = vrot.slane %v509_v55, 4  ;;  %v507_v63 = vrot.slane %v506_v54, 1  ;;  %v535_v21 = vrot.slane %v534_v5, 1 }
 0x3c5   :  { %v511_v52 = vadd.f32 %v510_v46, %v509_v55  ;;  %v508_v6 = vadd.f32 %v507_v63, %v506_v54  ;;  %v536_v29 = vadd.f32 %v535_v21, %v534_v5 }
 0x3c7   :  { %v512_v56 = vrot.slane %v511_v52, 2  ;;  %v466_v57 = vpop.permute.xlu0 %465  ;;  %v547_v22 = vsel %vm297_vm3, %v508_v6, %v546_v17 }
 0x3c8   :  { %v479_v38 = vmul.f32 %v466_v57, %v812_v48  ;;  %v521_v48 = vrot.slane %v520_v9, 1 }
 0x3c9   :  { %v513_v62 = vadd.f32 %v512_v56, %v511_v52 }
 0x3ca   :  { %v523_v1 = vsel %vm89_vm0, %v479_v38, 0.0  ;;  %v522_v11 = vadd.f32 %v521_v48, %v520_v9 }
 0x3cb   :  { %v514_v2 = vrot.slane %v513_v62, 1  ;;  %v524_v3 = vrot.slane %v523_v1, 4 }
 0x3cd   :  { %v525_v8 = vadd.f32 %v524_v3, %v523_v1  ;;  %v515_v12 = vadd.f32 %v514_v2, %v513_v62 }
 0x3cf   :  { %v526_v16 = vrot.slane %v525_v8, 2  ;;  %v548_v13 = vsel %vm299_vm4, %v515_v12, %v547_v22 }
 0x3d0   :  { %v549_v27 = vsel %vm301_vm5, %v522_v11, %v548_v13 }
 0x3d1   :  { %v527_v14 = vadd.f32 %v526_v16, %v525_v8 }
 0x3d3   :  { %v528_v23 = vrot.slane %v527_v14, 1 }
 0x3d5   :  { %v529_v28 = vadd.f32 %v528_v23, %v527_v14 }
 0x3d7   :  { %v550_v30 = vsel %vm303_vm6, %v529_v28, %v549_v27 }
 0x3d8   :  { %v551_v31 = vsel %vm305_vm7, %v536_v29, %v550_v30 }
 0x3d9   :  { %553 = vst.msk [vmem:[#allocation10] sm:$0xff] %vm89_vm0, %v551_v31 }
 0x3da   :  { %564 = dma.vmem_to_hbm [thread:$0]  %s560_s13, 128, %s562_s16, [#allocation4]  }
 0x3db   :  { %733 = dma.done.wait [#allocation4], 128  }
 0x3dc   :  { %734 = vsyncadd [#allocation4], 4294967168 }
 0x3dd   :  { %569 = vsyncpa [#allocation3], 1 }
 0x3de   :  { %570 = vsyncpa [#allocation6], 1 }
 0x3df   :  { %571 = vsyncpa [#allocation9], 1 }
 0x3e0   :  { %572 = vsyncpa [#allocation4], 1 }

</bundles_post_ra>
